<compile_context>
chip_gen: v6e
topology: v6e:2x2x1
jax: 0.10.0
libtpu: 0.0.40
codegen_flags: <defaults>
</compile_context>

<pallas_src>
import jax
import jax.numpy as jnp
from jax.experimental import pallas as pl
from jax.experimental.pallas import tpu as pltpu


def _round_up(x, m):
    return ((x + m - 1) // m) * m


# ------------------------------ Pallas kernel ------------------------------

def _proj_kernel(p_ref, w_ref, b_ref, o_ref):
    # p_ref: (TM, KP) bf16 patches tile, w_ref: (KP, NP) bf16 weight,
    # b_ref: (1, NP) f32 bias, o_ref: (TM, NP) f32 output tile.
    acc = jnp.dot(p_ref[...], w_ref[...], preferred_element_type=jnp.float32)
    o_ref[...] = (acc + b_ref[...]).astype(o_ref.dtype)


def _proj_matmul(patches, w, bias, *, tm, out_dtype=jnp.float32):
    """patches (MP, KP) @ w (KP, NP) + bias (1, NP) -> (MP, NP)."""
    MP, KP = patches.shape
    _, NP = w.shape
    assert MP % tm == 0, (MP, tm)

    flops = 2 * MP * KP * NP
    bytes_accessed = (patches.size * patches.dtype.itemsize
                      + w.size * w.dtype.itemsize
                      + bias.size * bias.dtype.itemsize
                      + MP * NP * jnp.dtype(out_dtype).itemsize)

    return pl.pallas_call(
        _proj_kernel,
        out_shape=jax.ShapeDtypeStruct((MP, NP), out_dtype),
        grid_spec=pltpu.PrefetchScalarGridSpec(
            num_scalar_prefetch=0,
            grid=(MP // tm,),
            in_specs=[
                pl.BlockSpec((tm, KP), lambda i: (i, 0)),   # patches: M-tiled
                pl.BlockSpec((KP, NP), lambda i: (0, 0)),   # weight: resident
                pl.BlockSpec((1, NP), lambda i: (0, 0)),    # bias: resident
            ],
            out_specs=pl.BlockSpec((tm, NP), lambda i: (i, 0)),
        ),
        compiler_params=pltpu.CompilerParams(
            dimension_semantics=("parallel",),          # shard M tiles across TCs
            vmem_limit_bytes=32 * 1024 * 1024,          # safe on v5e/v6e/v7x
        ),
        cost_estimate=pl.CostEstimate(
            flops=flops, transcendentals=0, bytes_accessed=bytes_accessed),
    )(patches, w, bias)


# ------------------------------ module wrapper ------------------------------

class PatchEmbedNew:
    """JAX/Pallas port of PatchEmbed_new (Conv2d proj + flatten + transpose)."""

    def __init__(self, img_size=(16, 16), patch_size=(4, 4), in_chans=4,
                 embed_dim=32, stride=(2, 2), key=None,
                 compute_dtype=jnp.bfloat16):
        self.img_size = img_size
        self.patch_size = patch_size
        self.stride = stride
        self.in_chans = in_chans
        self.embed_dim = embed_dim
        self.compute_dtype = compute_dtype

        H, W = img_size
        ph, pw = patch_size
        sh, sw = stride
        oh = (H - ph) // sh + 1
        ow = (W - pw) // sw + 1
        self.patch_hw = (oh, ow)
        self.num_patches = oh * ow

        # Deterministic parameter init (Conv2d weight: (embed_dim, C, ph, pw)).
        kw_key, kb_key = jax.random.split(key)
        fan_in = in_chans * ph * pw
        bound = 1.0 / jnp.sqrt(fan_in)
        self.weight = jax.random.uniform(
            kw_key, (embed_dim, in_chans, ph, pw),
            minval=-bound, maxval=bound, dtype=jnp.float32)
        self.bias = jax.random.uniform(
            kb_key, (embed_dim,), minval=-bound, maxval=bound,
            dtype=jnp.float32)

        # --- hoisted, padded, bf16 weight/bias prep (done once) ---
        K = in_chans * ph * pw
        self._K = K
        self._KP = _round_up(K, 128)                 # lane-dense contraction dim
        self._NP = _round_up(embed_dim, 128)         # lane-dense output dim
        w2d = self.weight.reshape(embed_dim, K).T    # (K, N), (C,ph,pw) flatten
        w_pad = jnp.zeros((self._KP, self._NP), dtype=compute_dtype)
        self._w_pad = w_pad.at[:K, :embed_dim].set(w2d.astype(compute_dtype))
        b_pad = jnp.zeros((1, self._NP), dtype=jnp.float32)
        self._b_pad = b_pad.at[0, :embed_dim].set(self.bias)

    def _extract_patches(self, x):
        """x (B,C,H,W) -> (B*oh*ow, C*ph*pw) in bf16, no activation transpose.

        conv_general_dilated_patches with out_spec NHWC yields patches whose
        feature dim is ordered (C, ph, pw) == PyTorch Conv2d weight flatten.
        """
        B = x.shape[0]
        oh, ow = self.patch_hw
        patches = jax.lax.conv_general_dilated_patches(
            x.astype(self.compute_dtype),
            filter_shape=self.patch_size,
            window_strides=self.stride,
            padding="VALID",
            dimension_numbers=("NCHW", "OIHW", "NHWC"),
        )                                              # (B, oh, ow, C*ph*pw)
        return patches.reshape(B * oh * ow, self._K)

    def __call__(self, x):
        B, C, H, W = x.shape
        oh, ow = self.patch_hw
        K, KP, NP, N = self._K, self._KP, self._NP, self.embed_dim

        patches = self._extract_patches(x)             # (M, K) bf16
        M = B * oh * ow

        # Tile/pad M so the grid divides evenly and stays VMEM-friendly.
        tm = min(512, _round_up(M, 128))
        MP = _round_up(M, tm)
        if MP != M or KP != K:
            patches = jnp.pad(patches, ((0, MP - M), (0, KP - K)))

        y = _proj_matmul(patches, self._w_pad, self._b_pad,
                         tm=tm, out_dtype=jnp.float32)  # (MP, NP)
        y = y[:M, :N]                                   # drop pad rows/cols
        # == proj(x).flatten(2).transpose(1, 2)
        return y.reshape(B, oh * ow, N)


# ------------------------------ reference (pure JAX) ------------------------------

def _reference_forward(x, weight, bias, stride):
    # NCHW conv, kernel = weight spatial size, given stride (fp32).
    y = jax.lax.conv_general_dilated(
        x, weight, window_strides=stride, padding="VALID",
        dimension_numbers=("NCHW", "OIHW", "NCHW"))
    y = y + bias[None, :, None, None]
    B, E, oh, ow = y.shape
    return jnp.transpose(y.reshape(B, E, oh * ow), (0, 2, 1))


# ------------------------------ main ------------------------------

if __name__ == "__main__":
    key = jax.random.PRNGKey(0)
    k_param, k_x = jax.random.split(key)

    B, C, H, W = 2, 4, 16, 16
    patch, stride, embed = (4, 4), (2, 2), 32

    mod = PatchEmbedNew(img_size=(H, W), patch_size=patch, in_chans=C,
                        embed_dim=embed, stride=stride, key=k_param)

    x = jax.random.normal(k_x, (B, C, H, W), dtype=jnp.float32)

    out = jax.block_until_ready(mod(x))

    ref = _reference_forward(x, mod.weight, mod.bias, stride)
    assert out.shape == (B, mod.num_patches, embed), out.shape
    # bf16 MXU operands (f32 accumulation) vs fp32 reference -> loosened tol.
    assert jnp.allclose(out, ref, atol=3e-2, rtol=3e-2), "mismatch vs reference"

    print("KERNEL_OK")
</pallas_src>

<mosaic_0001>
module attributes {stable_mosaic.version = 11 : i64} {
  func.func @_proj_kernel(%arg0: i32, %arg1: memref<128x128xbf16, #tpu.memory_space<vmem>>, %arg2: memref<128x128xbf16, #tpu.memory_space<vmem>>, %arg3: memref<1x128xf32, #tpu.memory_space<vmem>>, %arg4: memref<128x128xf32, #tpu.memory_space<vmem>>) attributes {dimension_semantics = [#tpu.dimension_semantics<parallel>], iteration_bounds = array<i64: 1>, scalar_prefetch = 0 : i64, scratch_operands = 0 : i64, tpu.core_type = #tpu.core_type<tc>, window_params = [{transform_indices = @transform_0, window_bounds = array<i64: 128, 128>}, {pipeline_mode = #tpu.pipeline_mode<synchronous>, transform_indices = @transform_1, window_bounds = array<i64: 128, 128>}, {pipeline_mode = #tpu.pipeline_mode<synchronous>, transform_indices = @transform_2, window_bounds = array<i64: 1, 128>}, {transform_indices = @transform_3, window_bounds = array<i64: 128, 128>}]} {
    %c0 = arith.constant 0 : index
    %c0_0 = arith.constant 0 : index
    %0 = vector.load %arg1[%c0, %c0_0] : memref<128x128xbf16, #tpu.memory_space<vmem>>, vector<128x128xbf16>
    %c0_1 = arith.constant 0 : index
    %c0_2 = arith.constant 0 : index
    %1 = vector.load %arg2[%c0_1, %c0_2] : memref<128x128xbf16, #tpu.memory_space<vmem>>, vector<128x128xbf16>
    %cst = arith.constant dense<0.000000e+00> : vector<128x128xf32>
    %2 = tpu.matmul %0, %1, %cst {dimension_numbers = #tpu.dot_dimension_numbers<[1], [0], [0], [1], [0, 0, 1, 1], [], []>} : vector<128x128xbf16>, vector<128x128xbf16>, vector<128x128xf32> -> vector<128x128xf32>
    %c0_3 = arith.constant 0 : index
    %c0_4 = arith.constant 0 : index
    %3 = vector.load %arg3[%c0_3, %c0_4] : memref<1x128xf32, #tpu.memory_space<vmem>>, vector<1x128xf32>
    %4 = vector.broadcast %3 : vector<1x128xf32> to vector<128x128xf32>
    %5 = arith.addf %2, %4 : vector<128x128xf32>
    %c0_5 = arith.constant 0 : index
    %c0_6 = arith.constant 0 : index
    %6 = vector.load %arg4[%c0_5, %c0_6] : memref<128x128xf32, #tpu.memory_space<vmem>>, vector<128x128xf32>
    tpu.vector_store %arg4[%c0_5, %c0_6], %5 {strides = array<i32>} : memref<128x128xf32, #tpu.memory_space<vmem>>, vector<128x128xf32>,
    return
  }
  func.func @transform_0(%arg0: i32) -> (i32, i32) {
    %c0_i32 = arith.constant 0 : i32
    %c0_i32_0 = arith.constant 0 : i32
    return %arg0, %c0_i32 : i32, i32
  }
  func.func @transform_1(%arg0: i32) -> (i32, i32) {
    %c0_i32 = arith.constant 0 : i32
    %c0_i32_0 = arith.constant 0 : i32
    %c0_i32_1 = arith.constant 0 : i32
    return %c0_i32, %c0_i32_0 : i32, i32
  }
  func.func @transform_2(%arg0: i32) -> (i32, i32) {
    %c0_i32 = arith.constant 0 : i32
    %c0_i32_0 = arith.constant 0 : i32
    %c0_i32_1 = arith.constant 0 : i32
    return %c0_i32, %c0_i32_0 : i32, i32
  }
  func.func @transform_3(%arg0: i32) -> (i32, i32) {
    %c0_i32 = arith.constant 0 : i32
    %c0_i32_0 = arith.constant 0 : i32
    return %arg0, %c0_i32 : i32, i32
  }
}

</mosaic_0001>

<bundles_post_ra>
// kernel: tpu_custom_call.1
= control target key start
LH: loop header
LB: loop body
LE: loop exit
PB: predicated region body
PF: predicated region fallthrough
CT: control target
= control target key end

     0   :  { %8 = vsyncpa [#allocation3], 0  ;;  %s519_s0 = inlined_call_operand.hbm [shape: bf16[128,128], index: 0, kind: input, shape index: {}]   ;;  %s520_s1 = inlined_call_operand.hbm [shape: bf16[128,128], index: 1, kind: input, shape index: {}]   ;;  %s521_s2 = inlined_call_operand.vmem [shape: f32[1,128], index: 2, kind: input, shape index: {}]   ;;  %s522_s3 = inlined_call_operand.hbm [shape: f32[128,128], index: 3, kind: output, shape index: {}]  }
   0x1   :  { %9 = vsyncpa [#allocation6], 0 }
   0x2   :  { %10 = vsyncpa [#allocation4], 0  ;;  %s480_s12 = smov [#allocation2]  }
   0x3   :  { %s16_s13 = sshll.u32 %s480_s12, 4  ;;  %s17_s13 = int_to_ptr.vmem [resolvable:$true] %s16_s13 }
   0x4   :  { %s422_s14 = scalar_lea.vmem %s17_s13, 1024  ;;  %p427_p1 = scmp.lt.s32.totalorder %s17_s13, %s17_s13 }
   0x5   :  { %p423_p0 = scmp.ne.s32.totalorder %s17_s13, %s422_s14  ;;  %p428_p2 = scmp.lt.s32.totalorder %s422_s14, %s422_s14 }
   0x7   :  { %p429_p3 = por %p428_p2, %p427_p1 }
   0x9   :  { %p430_p4 = pnand %p429_p3, %p423_p0 }
   0xb   :  { %433 = shalt.err (!%p430_p4)
}
   0xc   :  { %s481_s15 = smov 64   ;;  %s482_s16 = smov 4  }
   0xd   :  { %22 = dma.hbm_to_vmem [thread:$0]  %s519_s0, 1024, %s17_s13, [#allocation3], %s481_s15, %s481_s15, %s482_s16  }
   0xe   :  { %s483_s19 = smov [#allocation5]  }
   0xf   :  { %s28_s20 = sshll.u32 %s483_s19, 4  ;;  %s29_s20 = int_to_ptr.vmem [resolvable:$true] %s28_s20 }
  0x10   :  { %s442_s21 = scalar_lea.vmem %s29_s20, 1024  ;;  %p447_p6 = scmp.lt.s32.totalorder %s29_s20, %s29_s20 }
  0x11   :  { %p443_p5 = scmp.ne.s32.totalorder %s29_s20, %s442_s21  ;;  %p448_p7 = scmp.lt.s32.totalorder %s442_s21, %s442_s21 }
  0x13   :  { %p449_p8 = por %p448_p7, %p447_p6 }
  0x15   :  { %p450_p9 = pnand %p449_p8, %p443_p5 }
  0x17   :  { %453 = shalt.err (!%p450_p9)
}
  0x18   :  { %34 = dma.hbm_to_vmem [thread:$0]  %s520_s1, 1024, %s29_s20, [#allocation6], %s481_s15, %s481_s15, %s482_s16  }
  0x19   :  { %474 = dma.done.wait [#allocation3], 1024  }
  0x1a   :  { %475 = vsyncadd [#allocation3], 4294966272 }
  0x1b   :  { %476 = dma.done.wait [#allocation6], 1024  }
  0x1c   :  { %477 = vsyncadd [#allocation6], 4294966272  ;;  %v398_v0 = vld [vmem:[#allocation5 + $0x38] sm:$0xff]   ;;  %v399_v1 = vld [vmem:[#allocation5 + $0x30] sm:$0xff]  }
  0x1d   :  { %343 = vmatprep.subr.bf16.mxu0 %v398_v0  ;;  %375 = vmatprep.subr.bf16.mxu1 %v398_v0  ;;  %v400_v2 = vld [vmem:[#allocation5 + $0x28] sm:$0xff]   ;;  %v401_v3 = vld [vmem:[#allocation5 + $0x20] sm:$0xff]   ;;  %v402_v6 = vld [vmem:[#allocation5 + $0x18] sm:$0xff]  }
  0x1e   :  { %344 = vmatpush3.bf16.msra.mxu0 %v398_v0  ;;  %383 = vmatpush3.bf16.msra.mxu1 %v398_v0  ;;  %v406_v4 = vld [vmem:[#allocation2] sm:$0xff]   ;;  %v403_v7 = vld [vmem:[#allocation5 + $0x10] sm:$0xff]   ;;  %v404_v8 = vld [vmem:[#allocation5 + $0x8] sm:$0xff]  }
  0x1f   :  { %345 = vmatprep.subr.bf16.mxu0 %v399_v1  ;;  %376 = vmatprep.subr.bf16.mxu1 %v399_v1  ;;  %v407_v5 = vld [vmem:[#allocation2 + $0x20] sm:$0xff]   ;;  %v408_v10 = vld [vmem:[#allocation2 + $0x8] sm:$0xff]   ;;  %v410_v12 = vld [vmem:[#allocation2 + $0x10] sm:$0xff]  }
  0x20   :  { %359 = vmatprep.mubr.bf16.mxu0 %v406_v4  ;;  %367 = vmatprep.mubr.bf16.mxu1 %v407_v5  ;;  %v405_v9 = vld [vmem:[#allocation5] sm:$0xff]   ;;  %v409_v11 = vld [vmem:[#allocation2 + $0x28] sm:$0xff]   ;;  %v411_v13 = vld [vmem:[#allocation2 + $0x30] sm:$0xff]  }
  0x21   :  { %v412_v14 = vld [vmem:[#allocation2 + $0x18] sm:$0xff]   ;;  %v310_v16 = vld [vmem:[%s521_s2] ss:$0 sm:$0xff]  ;;  %s484_s2 = smov [#allocation7]  }
  0x22   :  { %346 = vmatpush3.bf16.msra.mxu0 %v399_v1  ;;  %384 = vmatpush3.bf16.msra.mxu1 %v399_v1  ;;  %v413_v15 = vld [vmem:[#allocation2 + $0x38] sm:$0xff]   ;;  %s297_s24 = sshll.u32 %s484_s2, 4  ;;  %s298_s24 = int_to_ptr.vmem [resolvable:$true] %s297_s24 }
  0x23   :  { %347 = vmatprep.subr.bf16.mxu0 %v400_v2  ;;  %377 = vmatprep.subr.bf16.mxu1 %v400_v2  ;;  %s454_s25 = scalar_lea.vmem %s298_s24, 2048  ;;  %p459_p11 = scmp.lt.s32.totalorder %s298_s24, %s298_s24 }
  0x24   :  { %p455_p10 = scmp.ne.s32.totalorder %s298_s24, %s454_s25  ;;  %p460_p12 = scmp.lt.s32.totalorder %s454_s25, %s454_s25 }
  0x26   :  { %348 = vmatpush3.bf16.msra.mxu0 %v400_v2  ;;  %385 = vmatpush3.bf16.msra.mxu1 %v400_v2  ;;  %p461_p13 = por %p460_p12, %p459_p11 }
  0x27   :  { %349 = vmatprep.subr.bf16.mxu0 %v401_v3  ;;  %378 = vmatprep.subr.bf16.mxu1 %v401_v3 }
  0x28   :  { %p462_p0 = pnand %p461_p13, %p455_p10 }
  0x2a   :  { %350 = vmatpush3.bf16.msra.mxu0 %v401_v3  ;;  %386 = vmatpush3.bf16.msra.mxu1 %v401_v3 }
  0x2b   :  { %351 = vmatprep.subr.bf16.mxu0 %v402_v6  ;;  %379 = vmatprep.subr.bf16.mxu1 %v402_v6 }
  0x2e   :  { %352 = vmatpush3.bf16.msra.mxu0 %v402_v6  ;;  %387 = vmatpush3.bf16.msra.mxu1 %v402_v6 }
  0x2f   :  { %353 = vmatprep.subr.bf16.mxu0 %v403_v7  ;;  %380 = vmatprep.subr.bf16.mxu1 %v403_v7 }
  0x32   :  { %354 = vmatpush3.bf16.msra.mxu0 %v403_v7  ;;  %388 = vmatpush3.bf16.msra.mxu1 %v403_v7 }
  0x33   :  { %355 = vmatprep.subr.bf16.mxu0 %v404_v8  ;;  %381 = vmatprep.subr.bf16.mxu1 %v404_v8 }
  0x36   :  { %356 = vmatpush3.bf16.msra.mxu0 %v404_v8  ;;  %389 = vmatpush3.bf16.msra.mxu1 %v404_v8 }
  0x37   :  { %357 = vmatprep.subr.bf16.mxu0 %v405_v9  ;;  %382 = vmatprep.subr.bf16.mxu1 %v405_v9 }
  0x3a   :  { %358 = vmatpush3.bf16.msra.mxu0 %v405_v9  ;;  %390 = vmatpush3.bf16.msra.mxu1 %v405_v9 }
  0x3d   :  { %360 = vmatmul.mubr.bf16.vlgmr.msra.gmra.mxu0 %v408_v10  ;;  %368 = vmatmul.mubr.bf16.vlgmr.msra.gmra.mxu1 %v409_v11 }
  0x3e   :  { %363 = vmatprep.mubr.bf16.mxu0 %v410_v12  ;;  %371 = vmatprep.mubr.bf16.mxu1 %v411_v13 }
  0x45   :  { %364 = vmatmul.mubr.bf16.gmra.mxu0 %v412_v14  ;;  %372 = vmatmul.mubr.bf16.gmra.mxu1 %v413_v15 }
  0xfd   :  { %v361_v17 = vpop.f32.mrf.mxu0  ;;  %v369_v18 = vpop.f32.mrf.mxu1 }
  0xfe   :  { %v222_v19 = vadd.f32 %v361_v17, %v310_v16  ;;  %v254_v20 = vadd.f32 %v369_v18, %v310_v16 }
  0xff   :  { %v213_v21 = vpop.f32.mrf.mxu0  ;;  %v245_v22 = vpop.f32.mrf.mxu1 }
 0x100   :  { %278 = vst [vmem:[#allocation7 + $0x10] sm:$0xff] %v222_v19  ;;  %286 = vst [vmem:[#allocation7 + $0x50] sm:$0xff] %v254_v20  ;;  %v214_v23 = vadd.f32 %v310_v16, %v213_v21  ;;  %v246_v24 = vadd.f32 %v310_v16, %v245_v22 }
 0x101   :  { %v362_v25 = vpop.f32.mrf.mxu0  ;;  %v370_v26 = vpop.f32.mrf.mxu1 }
 0x102   :  { %276 = vst [vmem:[#allocation7] sm:$0xff] %v214_v23  ;;  %284 = vst [vmem:[#allocation7 + $0x40] sm:$0xff] %v246_v24  ;;  %v225_v27 = vadd.f32 %v362_v25, %v310_v16  ;;  %v257_v28 = vadd.f32 %v370_v26, %v310_v16 }
 0x103   :  { %v216_v29 = vpop.f32.mrf.mxu0  ;;  %v248_v30 = vpop.f32.mrf.mxu1 }
 0x104   :  { %279 = vst [vmem:[#allocation7 + $0x18] sm:$0xff] %v225_v27  ;;  %287 = vst [vmem:[#allocation7 + $0x58] sm:$0xff] %v257_v28  ;;  %v217_v31 = vadd.f32 %v310_v16, %v216_v29  ;;  %v249_v32 = vadd.f32 %v310_v16, %v248_v30 }
 0x105   :  { %v365_v33 = vpop.f32.mrf.mxu0  ;;  %v373_v34 = vpop.f32.mrf.mxu1 }
 0x106   :  { %277 = vst [vmem:[#allocation7 + $0x8] sm:$0xff] %v217_v31  ;;  %285 = vst [vmem:[#allocation7 + $0x48] sm:$0xff] %v249_v32  ;;  %v238_v35 = vadd.f32 %v365_v33, %v310_v16  ;;  %v270_v36 = vadd.f32 %v373_v34, %v310_v16 }
 0x107   :  { %v229_v37 = vpop.f32.mrf.mxu0  ;;  %v261_v38 = vpop.f32.mrf.mxu1 }
 0x108   :  { %282 = vst [vmem:[#allocation7 + $0x30] sm:$0xff] %v238_v35  ;;  %290 = vst [vmem:[#allocation7 + $0x70] sm:$0xff] %v270_v36  ;;  %v230_v39 = vadd.f32 %v310_v16, %v229_v37  ;;  %v262_v40 = vadd.f32 %v310_v16, %v261_v38 }
 0x109   :  { %v366_v41 = vpop.f32.mrf.mxu0  ;;  %v374_v42 = vpop.f32.mrf.mxu1 }
 0x10a   :  { %280 = vst [vmem:[#allocation7 + $0x20] sm:$0xff] %v230_v39  ;;  %288 = vst [vmem:[#allocation7 + $0x60] sm:$0xff] %v262_v40  ;;  %v241_v43 = vadd.f32 %v366_v41, %v310_v16  ;;  %v273_v44 = vadd.f32 %v374_v42, %v310_v16 }
 0x10b   :  { %v232_v45 = vpop.f32.mrf.mxu0  ;;  %v264_v46 = vpop.f32.mrf.mxu1 }
 0x10c   :  { %283 = vst [vmem:[#allocation7 + $0x38] sm:$0xff] %v241_v43  ;;  %291 = vst [vmem:[#allocation7 + $0x78] sm:$0xff] %v273_v44  ;;  %v233_v47 = vadd.f32 %v310_v16, %v232_v45  ;;  %v265_v48 = vadd.f32 %v310_v16, %v264_v46 }
 0x10e   :  { %281 = vst [vmem:[#allocation7 + $0x28] sm:$0xff] %v233_v47  ;;  %289 = vst [vmem:[#allocation7 + $0x68] sm:$0xff] %v265_v48 }
 0x10f   :  { %465 = shalt.err (!%p462_p0)
}
 0x110   :  { %s485_s26 = smov 128   ;;  %s486_s27 = smov 8  }
 0x111   :  { %303 = dma.vmem_to_hbm [thread:$0]  %s298_s24, 2048, %s522_s3, [#allocation4], %s485_s26, %s485_s26, %s486_s27  }
 0x112   :  { %478 = dma.done.wait [#allocation4], 2048  }
 0x113   :  { %479 = vsyncadd [#allocation4], 4294965248 }
 0x114   :  { %307 = vsyncpa [#allocation3], 1 }
 0x115   :  { %308 = vsyncpa [#allocation6], 1 }
 0x116   :  { %309 = vsyncpa [#allocation4], 1 }

</bundles_post_ra>
